<compile_context>
chip_gen: v7x
topology: tpu7x:2x2x1
jax: 0.10.0
libtpu: 0.0.40
codegen_flags: <defaults>
</compile_context>

<pallas_src>
import functools

import jax
import jax.numpy as jnp
from jax import lax
from jax.experimental import pallas as pl
from jax.experimental.pallas import tpu as pltpu

_EPS = 1e-5  # nn.BatchNorm1d default eps
_LANES = 128


def _conv_stats_kernel(x_ref, w_ref, y_ref, s_ref, ss_ref, *, split_taps, c):
    """Pass 1: circular Conv1d(k=3) on the MXU + per-channel batch statistics.

    x_ref : (L, C) bf16  one batch element, C on lanes.
    w_ref : (3C, C) f32  flattened taps; row k*C + cin  <->  weight[cout, cin, k].
    y_ref : (L, C) bf16  conv output WITHOUT bias (bias cancels in batch-stat BN).
    s_ref, ss_ref : (1, C) f32 per-tile partial sum / sum-of-squares of y (f32).
    """
    x = x_ref[...].astype(jnp.float32)         # upcast once; rolls stay in f32
    L = x.shape[0]
    # circular padding == sublane rolls (XLU slot), no misaligned temporaries
    x_m1 = pltpu.roll(x, shift=1, axis=0)      # x[(l-1) mod L]
    x_p1 = pltpu.roll(x, shift=L - 1, axis=0)  # x[(l+1) mod L]

    if split_taps:
        # C >= 256: three accumulated K=C matmuls, no (L, 3C) temporary.
        y = jnp.dot(x_m1, w_ref[0:c, :], preferred_element_type=jnp.float32)
        y = y + jnp.dot(x, w_ref[c:2 * c, :], preferred_element_type=jnp.float32)
        y = y + jnp.dot(x_p1, w_ref[2 * c:3 * c, :], preferred_element_type=jnp.float32)
    else:
        # C <= 128: fuse the 3 taps into a single K=3C contraction (fills MXU).
        xs = jnp.concatenate([x_m1, x, x_p1], axis=1)           # (L, 3C)
        y = jnp.dot(xs, w_ref[...], preferred_element_type=jnp.float32)

    # stats from the f32 accumulator (before the bf16 store)
    s_ref[...] = jnp.sum(y, axis=0, keepdims=True)              # (1, C)
    ss_ref[...] = jnp.sum(y * y, axis=0, keepdims=True)         # (1, C)
    y_ref[...] = y.astype(y_ref.dtype)                          # bf16 HBM store


def _norm_elu_pool_kernel(y_ref, scale_ref, shift_ref, o_ref, z_scr):
    """Pass 2: fused BatchNorm affine -> ELU -> MaxPool1d(3, 2, 1).

    y_ref : (L, C) bf16; scale_ref/shift_ref : (1, C) f32; o_ref : (L_out, C) f32.
    z_scr : (L, C) f32 VMEM scratch used for the stride-2 decimation loads.
    """
    L_out = o_ref.shape[0]
    # elementwise math in f32 (v5e VPU/EUP have no bf16 datapath)
    a = y_ref[...].astype(jnp.float32) * scale_ref[...] + shift_ref[...]
    z_scr[...] = jnp.where(a > 0, a, jnp.exp(jnp.minimum(a, 0.0)) - 1.0)

    # stride-2 decimation via sublane-strided loads from the f32 scratch
    z_even = z_scr[pl.ds(0, L_out, stride=2), :]   # z[2j]
    z_odd = z_scr[pl.ds(1, L_out, stride=2), :]    # z[2j+1]

    # pool window j covers positions {2j-1, 2j, 2j+1}; 2j-1 is the previous
    # odd position, and the -inf left padding of MaxPool1d for j == 0.
    j = lax.broadcasted_iota(jnp.int32, z_odd.shape, 0)
    z_prev_odd = jnp.where(j == 0, -jnp.inf, pltpu.roll(z_odd, shift=1, axis=0))
    o_ref[...] = jnp.maximum(jnp.maximum(z_prev_odd, z_even), z_odd)


def _vmem_limit(nbytes):
    return int(min(max(nbytes, 32 * 1024 * 1024), 100 * 1024 * 1024))


def conv_layer_forward(x_blc, conv_w, conv_b, bn_w, bn_b):
    """x_blc: (B, L, C); conv_w: (C, C, 3) [out, in, k]; conv_b/bn_w/bn_b: (C,)."""
    B, L, C = x_blc.shape
    assert L % 2 == 0 and L >= 2, "kernel assumes even sequence length >= 2"
    # TODO(synk): odd L (MaxPool1d handles it via the right -inf pad) unsupported.
    L_out = (L + 2 - 3) // 2 + 1  # PyTorch MaxPool1d(k=3, s=2, p=1) output length

    # pad ragged large channel widths to a multiple of 128 for lane-dense stores
    if C > _LANES and C % _LANES != 0:
        Cp = ((C + _LANES - 1) // _LANES) * _LANES
    else:
        Cp = C
    pad = Cp - C

    x = x_blc.astype(jnp.bfloat16)            # halves x HBM traffic into pass 1
    if pad:
        x = jnp.pad(x, ((0, 0), (0, 0), (0, pad)))
        conv_w = jnp.pad(conv_w, ((0, pad), (0, pad), (0, 0)))
        bn_w = jnp.pad(bn_w, (0, pad))        # zero gamma => padded channels -> 0
        bn_b = jnp.pad(bn_b, (0, pad))

    # (C_out, C_in, 3) -> (3*C_in, C_out); row index = tap * Cp + in_channel
    w_flat = jnp.transpose(conv_w, (2, 1, 0)).reshape(3 * Cp, Cp).astype(jnp.float32)
    split_taps = Cp >= 256

    # ---- pass 1: circular conv + per-channel partial statistics ----
    vmem1 = _vmem_limit(48 * L * Cp + 40 * Cp * Cp + (2 << 20))
    y, s, ss = pl.pallas_call(
        functools.partial(_conv_stats_kernel, split_taps=split_taps, c=Cp),
        grid=(B,),
        in_specs=[
            pl.BlockSpec((None, L, Cp), lambda b: (b, 0, 0)),
            pl.BlockSpec((3 * Cp, Cp), lambda b: (0, 0)),
        ],
        out_specs=(
            pl.BlockSpec((None, L, Cp), lambda b: (b, 0, 0)),
            pl.BlockSpec((None, 1, Cp), lambda b: (b, 0, 0)),
            pl.BlockSpec((None, 1, Cp), lambda b: (b, 0, 0)),
        ),
        out_shape=(
            jax.ShapeDtypeStruct((B, L, Cp), jnp.bfloat16),
            jax.ShapeDtypeStruct((B, 1, Cp), jnp.float32),
            jax.ShapeDtypeStruct((B, 1, Cp), jnp.float32),
        ),
        compiler_params=pltpu.CompilerParams(
            dimension_semantics=("parallel",), vmem_limit_bytes=vmem1),
        # TODO(synk): on v7x verify the B axis shards across both TensorCores;
        # if not, switch to pltpu.CORE_PARALLEL / core_map for this axis.
    )(x, w_flat)

    # ---- tiny cross-tile reduction; fold BN affine into per-channel scale/shift.
    # Training-mode BN uses batch statistics, so the conv bias (a per-channel
    # constant) cancels exactly and never needs to be added. ----
    del conv_b  # no effect on the forward output under batch-stat BatchNorm
    n = jnp.float32(B * L)
    mean = jnp.sum(s, axis=0) / n                                  # (1, Cp)
    var = jnp.maximum(jnp.sum(ss, axis=0) / n - mean * mean, 0.0)  # biased variance
    scale = bn_w.astype(jnp.float32)[None, :] * lax.rsqrt(var + _EPS)
    shift = bn_b.astype(jnp.float32)[None, :] - mean * scale

    # ---- pass 2: normalize + ELU + MaxPool1d(3, 2, 1) ----
    vmem2 = _vmem_limit(24 * L * Cp + (2 << 20))
    out_p = pl.pallas_call(
        _norm_elu_pool_kernel,
        grid=(B,),
        in_specs=[
            pl.BlockSpec((None, L, Cp), lambda b: (b, 0, 0)),
            pl.BlockSpec((1, Cp), lambda b: (0, 0)),
            pl.BlockSpec((1, Cp), lambda b: (0, 0)),
        ],
        out_specs=pl.BlockSpec((None, L_out, Cp), lambda b: (b, 0, 0)),
        out_shape=jax.ShapeDtypeStruct((B, L_out, Cp), jnp.float32),
        scratch_shapes=[pltpu.VMEM((L, Cp), jnp.float32)],
        compiler_params=pltpu.CompilerParams(
            dimension_semantics=("parallel",), vmem_limit_bytes=vmem2),
    )(y, scale, shift)

    return out_p[:, :, :C] if pad else out_p


def _reference_forward(x_blc, conv_w, conv_b, bn_w, bn_b):
    """Pure-JAX reference implementing the same PyTorch semantics."""
    xc = jnp.transpose(x_blc, (0, 2, 1))
    B, C, L = xc.shape
    xp = jnp.concatenate([xc[..., -1:], xc, xc[..., :1]], axis=-1)
    y = sum(
        jnp.einsum("oc,bcl->bol", conv_w[:, :, k], xp[..., k:k + L])
        for k in range(3)
    ) + conv_b[None, :, None]
    mean = y.mean(axis=(0, 2), keepdims=True)
    var = ((y - mean) ** 2).mean(axis=(0, 2), keepdims=True)
    yn = (y - mean) / jnp.sqrt(var + _EPS) * bn_w[None, :, None] + bn_b[None, :, None]
    z = jnp.where(yn > 0, yn, jnp.exp(jnp.minimum(yn, 0.0)) - 1.0)
    zpad = jnp.pad(z, ((0, 0), (0, 0), (1, 1)), constant_values=-jnp.inf)
    L_out = (L + 2 - 3) // 2 + 1
    pooled = jnp.stack(
        [jnp.max(zpad[..., 2 * i:2 * i + 3], axis=-1) for i in range(L_out)], axis=-1
    )
    return jnp.transpose(pooled, (0, 2, 1))


def _run_case(key, B, L, C):
    kw, kb, kg, kbt, kx = jax.random.split(key, 5)
    conv_w = jax.random.normal(kw, (C, C, 3), jnp.float32) / jnp.sqrt(3.0 * C)
    conv_b = 0.1 * jax.random.normal(kb, (C,), jnp.float32)
    bn_w = 1.0 + 0.1 * jax.random.normal(kg, (C,), jnp.float32)
    bn_b = 0.1 * jax.random.normal(kbt, (C,), jnp.float32)
    x = jax.random.normal(kx, (B, L, C), jnp.float32)

    out = jax.block_until_ready(conv_layer_forward(x, conv_w, conv_b, bn_w, bn_b))
    # reference fed the bf16-quantized input the kernel actually consumes
    x_q = x.astype(jnp.bfloat16).astype(jnp.float32)
    ref = jax.block_until_ready(_reference_forward(x_q, conv_w, conv_b, bn_w, bn_b))

    L_out = (L + 2 - 3) // 2 + 1
    assert out.shape == (B, L_out, C), out.shape
    max_err = float(jnp.max(jnp.abs(out - ref)))
    # bf16 MXU passes + bf16 y intermediate vs the f32 reference
    assert jnp.allclose(out, ref, rtol=3e-2, atol=3e-2), max_err


if __name__ == "__main__":
    key = jax.random.PRNGKey(0)
    k1, k2 = jax.random.split(key)
    # small case: C <= 128 -> fused K=3C matmul path, no channel padding
    _run_case(k1, B=2, L=16, C=8)
    # ragged-width case: C=144 -> padded to 256 lanes, split-tap matmul path
    _run_case(k2, B=2, L=16, C=144)
    print("KERNEL_OK")
</pallas_src>

<mosaic_0001>
module attributes {stable_mosaic.version = 11 : i64} {
  func.func @_conv_stats_kernel(%arg0: i32, %arg1: memref<1x16x8xbf16, #tpu.memory_space<vmem>>, %arg2: memref<24x8xf32, #tpu.memory_space<vmem>>, %arg3: memref<1x16x8xbf16, #tpu.memory_space<vmem>>, %arg4: memref<1x1x8xf32, #tpu.memory_space<vmem>>, %arg5: memref<1x1x8xf32, #tpu.memory_space<vmem>>) attributes {dimension_semantics = [#tpu.dimension_semantics<parallel>], iteration_bounds = array<i64: 2>, scalar_prefetch = 0 : i64, scratch_operands = 0 : i64, tpu.core_type = #tpu.core_type<tc>, window_params = [{transform_indices = @transform_0, window_bounds = array<i64: 1, 16, 8>}, {pipeline_mode = #tpu.pipeline_mode<synchronous>, transform_indices = @transform_1, window_bounds = array<i64: 24, 8>}, {transform_indices = @transform_2, window_bounds = array<i64: 1, 16, 8>}, {transform_indices = @transform_3, window_bounds = array<i64: 1, 1, 8>}, {transform_indices = @transform_4, window_bounds = array<i64: 1, 1, 8>}]} {
    %c0 = arith.constant 0 : index
    %c0_0 = arith.constant 0 : index
    %c0_1 = arith.constant 0 : index
    %0 = vector.load %arg1[%c0, %c0_0, %c0_1] : memref<1x16x8xbf16, #tpu.memory_space<vmem>>, vector<1x16x8xbf16>
    %1 = vector.shape_cast %0 : vector<1x16x8xbf16> to vector<16x8xbf16>
    %2 = arith.extf %1 : vector<16x8xbf16> to vector<16x8xf32>
    %c1_i32 = arith.constant 1 : i32
    %3 = tpu.dynamic_rotate %2 by %c1_i32 dim 0 : vector<16x8xf32>, i32 -> vector<16x8xf32>
    %c15_i32 = arith.constant 15 : i32
    %4 = tpu.dynamic_rotate %2 by %c15_i32 dim 0 : vector<16x8xf32>, i32 -> vector<16x8xf32>
    %5 = tpu.concatenate %3, %2, %4 in 1 : vector<16x8xf32>, vector<16x8xf32>, vector<16x8xf32> -> vector<16x24xf32>
    %c0_2 = arith.constant 0 : index
    %c0_3 = arith.constant 0 : index
    %6 = vector.load %arg2[%c0_2, %c0_3] : memref<24x8xf32, #tpu.memory_space<vmem>>, vector<24x8xf32>
    %cst = arith.constant dense<0.000000e+00> : vector<16x8xf32>
    %7 = tpu.matmul %5, %6, %cst {dimension_numbers = #tpu.dot_dimension_numbers<[1], [0], [0], [1], [0, 0, 1, 1], [], []>} : vector<16x24xf32>, vector<24x8xf32>, vector<16x8xf32> -> vector<16x8xf32>
    %cst_4 = arith.constant dense<0.000000e+00> : vector<8xf32>
    %8 = vector.multi_reduction <add>, %7, %cst_4 [0] : vector<16x8xf32> to vector<8xf32>
    %9 = vector.shape_cast %8 : vector<8xf32> to vector<1x8xf32>
    %c0_5 = arith.constant 0 : index
    %c0_6 = arith.constant 0 : index
    %c0_7 = arith.constant 0 : index
    %10 = vector.load %arg4[%c0_5, %c0_6, %c0_7] : memref<1x1x8xf32, #tpu.memory_space<vmem>>, vector<1x1x8xf32>
    %11 = vector.shape_cast %10 : vector<1x1x8xf32> to vector<1x8xf32>
    %12 = vector.shape_cast %9 : vector<1x8xf32> to vector<1x1x8xf32>
    tpu.vector_store %arg4[%c0_5, %c0_6, %c0_7], %12 {strides = array<i32>} : memref<1x1x8xf32, #tpu.memory_space<vmem>>, vector<1x1x8xf32>,
    %13 = arith.mulf %7, %7 : vector<16x8xf32>
    %cst_8 = arith.constant dense<0.000000e+00> : vector<8xf32>
    %14 = vector.multi_reduction <add>, %13, %cst_8 [0] : vector<16x8xf32> to vector<8xf32>
    %15 = vector.shape_cast %14 : vector<8xf32> to vector<1x8xf32>
    %c0_9 = arith.constant 0 : index
    %c0_10 = arith.constant 0 : index
    %c0_11 = arith.constant 0 : index
    %16 = vector.load %arg5[%c0_9, %c0_10, %c0_11] : memref<1x1x8xf32, #tpu.memory_space<vmem>>, vector<1x1x8xf32>
    %17 = vector.shape_cast %16 : vector<1x1x8xf32> to vector<1x8xf32>
    %18 = vector.shape_cast %15 : vector<1x8xf32> to vector<1x1x8xf32>
    tpu.vector_store %arg5[%c0_9, %c0_10, %c0_11], %18 {strides = array<i32>} : memref<1x1x8xf32, #tpu.memory_space<vmem>>, vector<1x1x8xf32>,
    %19 = arith.truncf %7 : vector<16x8xf32> to vector<16x8xbf16>
    %c0_12 = arith.constant 0 : index
    %c0_13 = arith.constant 0 : index
    %c0_14 = arith.constant 0 : index
    %20 = vector.load %arg3[%c0_12, %c0_13, %c0_14] : memref<1x16x8xbf16, #tpu.memory_space<vmem>>, vector<1x16x8xbf16>
    %21 = vector.shape_cast %20 : vector<1x16x8xbf16> to vector<16x8xbf16>
    %22 = vector.shape_cast %19 : vector<16x8xbf16> to vector<1x16x8xbf16>
    tpu.vector_store %arg3[%c0_12, %c0_13, %c0_14], %22 {strides = array<i32>} : memref<1x16x8xbf16, #tpu.memory_space<vmem>>, vector<1x16x8xbf16>,
    return
  }
  func.func @transform_0(%arg0: i32) -> (i32, i32, i32) {
    %c0_i32 = arith.constant 0 : i32
    %c0_i32_0 = arith.constant 0 : i32
    %c0_i32_1 = arith.constant 0 : i32
    return %arg0, %c0_i32, %c0_i32_0 : i32, i32, i32
  }
  func.func @transform_1(%arg0: i32) -> (i32, i32) {
    %c0_i32 = arith.constant 0 : i32
    %c0_i32_0 = arith.constant 0 : i32
    %c0_i32_1 = arith.constant 0 : i32
    return %c0_i32, %c0_i32_0 : i32, i32
  }
  func.func @transform_2(%arg0: i32) -> (i32, i32, i32) {
    %c0_i32 = arith.constant 0 : i32
    %c0_i32_0 = arith.constant 0 : i32
    %c0_i32_1 = arith.constant 0 : i32
    return %arg0, %c0_i32, %c0_i32_0 : i32, i32, i32
  }
  func.func @transform_3(%arg0: i32) -> (i32, i32, i32) {
    %c0_i32 = arith.constant 0 : i32
    %c0_i32_0 = arith.constant 0 : i32
    %c0_i32_1 = arith.constant 0 : i32
    return %arg0, %c0_i32, %c0_i32_0 : i32, i32, i32
  }
  func.func @transform_4(%arg0: i32) -> (i32, i32, i32) {
    %c0_i32 = arith.constant 0 : i32
    %c0_i32_0 = arith.constant 0 : i32
    %c0_i32_1 = arith.constant 0 : i32
    return %arg0, %c0_i32, %c0_i32_0 : i32, i32, i32
  }
}

</mosaic_0001>

<bundles_post_ra>
// kernel: tpu_custom_call.1
= control target key start
LH: loop header
LB: loop body
LE: loop exit
PB: predicated region body
PF: predicated region fallthrough
CT: control target
= control target key end

     0   :  { %10 = vsyncpa [#allocation3], 0  ;;  %s908_s0 = inlined_call_operand.vmem [shape: bf16[2,16,8], index: 0, kind: input, shape index: {}]   ;;  %s909_s1 = inlined_call_operand.vmem [shape: f32[24,8], index: 1, kind: input, shape index: {}]   ;;  %s910_s2 = inlined_call_operand.vmem [shape: bf16[2,16,8], index: 2, kind: output, shape index: {0}]   ;;  %s911_s3 = inlined_call_operand.hbm [shape: f32[2,1,8], index: 3, kind: output, shape index: {1}]   ;;  %s912_s4 = inlined_call_operand.hbm [shape: f32[2,1,8], index: 4, kind: output, shape index: {2}]  }
   0x1   :  { %12 = vsyncpa [#allocation3 + $0x1], 0 }
   0x2   :  { %13 = vsyncpa [#allocation5], 0 }
   0x3   :  { %15 = vsyncpa [#allocation5 + $0x1], 0  ;;  %s743_s15 = smov 0   ;;  %s745_s16 = smov 0  }
   0x4   :  { %s747_s17 = smov 0   ;;  %s749_s18 = smov 0  }
   0x5 LB: > { %s764_s19 = sadd.s32 4294967295, %s712_s18   ;;  %s520_s20 = sadd.s32 4294967294, %s712_s18   ;;  %s712_s18 = sphi %s749_s18, %s918_s18   ;;  %s708_s17 = sphi %s747_s17, %s917_s17   ;;  %s704_s16 = sphi %s745_s16, %s916_s16   ;;  %s700_s15 = sphi %s743_s15, %s915_s15  }
   0x6   : > { %s768_s21 = sadd.s32 1, %s712_s18   ;;  %s101_s22 = sadd.s32 1, %s708_s17 }
   0x7   : > { %s98_s23 = ssub.s32 %s712_s18, %s768_s21  ;;  %p111_p0 = scmp.ne.s32.totalorder %s708_s17, %s704_s16 }
   0x8   : > { %p99_p1 = scmp.eq.s32.totalorder %s98_s23, 0  ;;  %p112_p2 = scmp.eq.s32.totalorder %s764_s19, 1 }
   0x9   : > { %p117_p3 = scmp.ne.s32.totalorder %s704_s16, %s700_s15  ;;  %p118_p4 = scmp.eq.s32.totalorder %s520_s20, 1 }
   0xa   : > { %s779_s24 = scalar_select %p99_p1, %s708_s17, %s101_s22  }
   0xb   : > { %p781_p5 = por %p112_p2, %p111_p0  ;;  %p785_p6 = por %p118_p4, %p117_p3 }
   0xc   : > { %p523_p7 = scmp.ge.s32.totalorder %s712_s18, 1  ;;  %p173_p8 = scmp.lt.s32.totalorder %s712_s18, 3 }
   0xe   : > { %p174_p9 = pnand %p523_p7, %p173_p8 }
   0xf   : > { %p207_p10 = scmp.lt.s32.totalorder (!%p174_p9), %s764_s19, 1  ;;  %v223_v0 = vlaneseq (!%p174_p9)  ;;  %v255_v1 = vld [vmem:[%s909_s1] sm:$0xff] (!%p174_p9)  ;;  %v256_v2 = vld [vmem:[%s909_s1 + $0x8] sm:$0xff] (!%p174_p9)  ;;  %v257_v4 = vld [vmem:[%s909_s1 + $0x10] sm:$0xff] (!%p174_p9)  ;;  %s714_s12 = smov (!%p174_p9), 8   ;;  %vm249_vm2 = vcmask (!%p174_p9), 64512  }
  0x10   : > { %177 = sbr.rel (%p174_p9) target bundleno = 420 (0x1a4), region = 28  ;;  %v558_v3 = vpack.c.bf16 (!%p174_p9), %v256_v2, %v255_v1  ;;  %s715_s13 = smov (!%p174_p9), 16   ;;  %vm252_vm3 = vcmask (!%p174_p9), 130048   ;;  %vm258_vm4 = vcmask (!%p174_p9), 195584   ;;  %vm371_vm5 = vcmask (!%p174_p9), 60416  }
  0x11   : > { %v224_v5 = vshrl.u32 (!%p174_p9), %v223_v0, 7  ;;  %s822_s23 = sand.u32 (!%p174_p9), 1, %s704_s16   ;;  %s532_s27 = sshll.u32 (!%p174_p9), %s764_s19, 4  ;;  %vm349_vm6 = vcmask (!%p174_p9), 57344  }
  0x12   : > { %559 = vmatprep.subr.bf16.mxu0 (!%p174_p9), %v558_v3  ;;  %s200_s28 = scalar_lea.vmem (!%p174_p9), [#allocation2], %s822_s23  ;;  %s206_s30 = scalar_lea.vmem (!%p174_p9), [#allocation4], %s822_s23 }
  0x13   : > { %561 = vmatpush3.bf16.msra.mxu0 (!%p174_p9), %v558_v3  ;;  %vm230_vm0 = vcmp.lt.s32.totalorder (!%p174_p9), %v224_v5, 7  ;;  %vm225_vm1 = vcmp.lt.s32.totalorder (!%p174_p9), %v224_v5, 1  ;;  %s399_s29 = sshll.u32 (!%p174_p9), %s200_s28, 4  ;;  %s840_s10 = scalar_lea.hbm (!%p174_p9), %s912_s4, %s532_s27  ;;  %s834_s29 = int_to_ptr.vmem [resolvable:$true] %s399_s29 }
  0x14   : > { %553 = vmatprep.subr.mxu0 (!%p174_p9), %v257_v4 }
  0x17   : > { %s799_s5 = scalar_select %p207_p10, %s764_s19, 1  ;;  %554 = vmatpush3.msra.mxu0 %v257_v4 }
  0x19   : > { %s536_s8 = sshll.u32 %s799_s5, 3  ;;  %s412_s5 = sshll.u32 %s206_s30, 4  ;;  %s842_s5 = int_to_ptr.vmem [resolvable:$true] %s412_s5 }
  0x1a   : > { %s211_s11 = scalar_lea.vmem %s908_s0, %s536_s8  ;;  %s216_s22 = scalar_lea.vmem %s910_s2, %s536_s8 }
  0x1b   : > { %v541_v6 = vld [vmem:[%s211_s11] sm:$0xff]   ;;  %s832_s8 = scalar_lea.hbm %s911_s3, %s532_s27  ;;  %s380_s11 = scalar_lea.sflag [#allocation3], %s822_s23 }
  0x1c   : > { %v542_v7 = vunpack.c.l.bf16 %v541_v6  ;;  %v543_v8 = vunpack.c.h.bf16 %v541_v6 }
  0x1e   : > { %v608_v9 = vpack.i.bf16 %v543_v8, %v542_v7  ;;  %v228_v10 = vrot.slane %v542_v7, 1  ;;  %v229_v11 = vrot.slane %v543_v8, 1  ;;  %v221_v12 = vrot.slane %v542_v7, 7 }
  0x1f   : > { %v222_v13 = vrot.slane %v543_v8, 7 }
  0x20   : > { %609 = vrot.lane.b32.xlu0 %v608_v9, %s714_s12  ;;  %v231_v14 = vsel %vm230_vm0, %v228_v10, %v229_v11  ;;  %v232_v15 = vsel %vm230_vm0, %v229_v11, %v228_v10  ;;  %s618_s12 = scalar_lea.vmem %s834_s29, 16 }
  0x21   : > { %v613_v16 = vpack.i.bf16 %v232_v15, %v231_v14  ;;  %v227_v17 = vsel %vm225_vm1, %v222_v13, %v221_v12  ;;  %v226_v18 = vsel %vm225_vm1, %v221_v12, %v222_v13  ;;  %p619_p11 = scmp.ne.s32.totalorder %s834_s29, %s618_s12 }
  0x23   : > { %p620_p12 = pnand %p619_p11, %p781_p5 }
  0x24   : > { %614 = vrot.lane.b32.xlu0 %v613_v16, %s715_s13  ;;  %s716_s13 = smov [#allocation2]  }
  0x25   : > { %p621_p13 = pneg %p620_p12  ;;  %s622_s14 = sshll.u32 %s716_s13, 4  ;;  %s623_s14 = int_to_ptr.vmem [resolvable:$false] %s622_s14 }
  0x26   : > { %s624_s20 = scalar_lea.vmem %s623_s14, 32  ;;  %p625_p0 = scmp.lt.s32.totalorder %s834_s29, %s623_s14 }
  0x27   : > { %p626_p1 = scmp.lt.s32.totalorder %s624_s20, %s618_s12 }
  0x29   : > { %p627_p2 = por %p626_p1, %p625_p0 }
  0x2b   : > { %p628_p3 = pnand %p627_p2, %p621_p13 }
  0x92   : > { %v610_v19 = vpop.permute.xlu0 %609 }
  0x93   : > { %v612_v20 = vunpack.i.h.bf16 %v610_v19  ;;  %v611_v21 = vunpack.i.l.bf16 %v610_v19 }
  0x95   : > { %v250_v25 = vsel %vm249_vm2, %v227_v17, %v611_v21  ;;  %v251_v26 = vsel %vm249_vm2, %v226_v18, %v612_v20 }
  0x96   : > { %v615_v22 = vpop.permute.xlu0 %614 }
  0x97   : > { %v617_v23 = vunpack.i.h.bf16 %v615_v22  ;;  %v616_v24 = vunpack.i.l.bf16 %v615_v22 }
  0x99   : > { %v253_v27 = vsel %vm252_vm3, %v250_v25, %v616_v24  ;;  %v254_v28 = vsel %vm252_vm3, %v251_v26, %v617_v23 }
  0x9a   : > { %555 = vmatprep.mubr.msk.f32.mxu0 %vm258_vm4, %v253_v27 }
  0x9b   : > { %556 = vmatmul.mubr.msk.f32.vlgmr.msra.gmra.mrb[0].mxu0 %vm258_vm4, %v254_v28 }
 0x16e   : > { %v557_v29 = vpop.f32.mrb[0].mxu0 }
 0x16f   : > { %v341_v30 = vsel %vm249_vm2, %v557_v29, 0.0  ;;  %v352_v31 = vmul.f32 %v557_v29, %v557_v29  ;;  %v539_v32 = vpack.c.bf16 %v557_v29, %v557_v29  ;;  %v331_v33 = vpop.f32.mrb[1].mxu0 }
 0x170   : > { %v340_v34 = vsel %vm249_vm2, %v331_v33, 0.0  ;;  %v351_v35 = vmul.f32 %v331_v33, %v331_v33  ;;  %v538_v36 = vpack.c.bf16 %v331_v33, %v331_v33 }
 0x171   : > { %v354_v37 = vsel %vm249_vm2, %v352_v31, 0.0  ;;  %373 = vst.msk [vmem:[%s216_s22 + $0x4] sm:$0xf] %vm371_vm5, %v539_v32  ;;  %v342_v38 = vadd.f32 %v341_v30, %v340_v34 }
 0x172   : > { %v353_v39 = vsel %vm249_vm2, %v351_v35, 0.0  ;;  %372 = vst.msk [vmem:[%s216_s22] sm:$0xf] %vm371_vm5, %v538_v36 }
 0x173   : > { %v343_v40 = vrot.slane %v342_v38, 4  ;;  %v355_v41 = vadd.f32 %v354_v37, %v353_v39 }
 0x175   : > { %v344_v42 = vadd.f32 %v343_v40, %v342_v38  ;;  %v356_v43 = vrot.slane %v355_v41, 4 }
 0x177   : > { %v345_v44 = vrot.slane %v344_v42, 2  ;;  %v357_v45 = vadd.f32 %v356_v43, %v355_v41 }
 0x179   : > { %v346_v46 = vadd.f32 %v345_v44, %v344_v42  ;;  %v358_v47 = vrot.slane %v357_v45, 2 }
 0x17b   : > { %v347_v48 = vrot.slane %v346_v46, 1  ;;  %v359_v49 = vadd.f32 %v358_v47, %v357_v45 }
 0x17d   : > { %v348_v50 = vadd.f32 %v347_v48, %v346_v46  ;;  %v360_v51 = vrot.slane %v359_v49, 1 }
 0x17f   : > { %350 = vst.msk [vmem:[%s200_s28] sm:$0x1] %vm349_vm6, %v348_v50  ;;  %v361_v52 = vadd.f32 %v360_v51, %v359_v49 }
 0x180   : > { %631 = shalt.err (!%p628_p3)
}
 0x181   : > { %s632_s22 = scalar_lea.hbm %s832_s8, 16  ;;  %s636_s6 = scalar_lea.hbm %s911_s3, 32 }
 0x182   : > { %p633_p4 = scmp.ne.s32.totalorder %s832_s8, %s632_s22  ;;  %p637_p9 = scmp.lt.u32.totalorder %s832_s8, %s911_s3 }
 0x183   : > { %p638_p10 = scmp.lt.u32.totalorder %s636_s6, %s632_s22  ;;  %p640_p12 = scmp.lt.u32.totalorder %s632_s22, %s832_s8 }
 0x184   : > { %p634_p7 = pnand %p633_p4, %p781_p5 }
 0x185   : > { %p639_p11 = por %p638_p10, %p637_p9 }
 0x186   : > { %p635_p8 = pneg %p634_p7 }
 0x187   : > { %p641_p13 = por %p640_p12, %p639_p11 }
 0x189   : > { %p642_p0 = pnand %p641_p13, %p635_p8 }
 0x18b   : > { %645 = shalt.err (!%p642_p0)
}
 0x18c   : > { %562 = dma.vmem_to_hbm [thread:$0]  (%p781_p5), %s834_s29, 16, %s832_s8, %s380_s11   ;;  %362 = vst.msk [vmem:[%s206_s30] sm:$0x1] %vm349_vm6, %v361_v52 }
 0x18d   : > { %s384_s9 = scalar_lea.sflag [#allocation5], %s822_s23  ;;  %s646_s12 = scalar_lea.vmem %s842_s5, 16 }
 0x18e   : > { %p647_p1 = scmp.ne.s32.totalorder %s842_s5, %s646_s12  ;;  %s717_s13 = smov [#allocation4]  }
 0x18f   : > { %s650_s14 = sshll.u32 %s717_s13, 4  ;;  %s651_s14 = int_to_ptr.vmem [resolvable:$false] %s650_s14 }
 0x190   : > { %p648_p2 = pnand %p647_p1, %p781_p5  ;;  %s652_s20 = scalar_lea.vmem %s651_s14, 32 }
 0x191   : > { %p653_p4 = scmp.lt.s32.totalorder %s842_s5, %s651_s14  ;;  %p654_p7 = scmp.lt.s32.totalorder %s652_s20, %s646_s12 }
 0x192   : > { %p649_p3 = pneg %p648_p2 }
 0x193   : > { %p655_p8 = por %p654_p7, %p653_p4 }
 0x195   : > { %p656_p9 = pnand %p655_p8, %p649_p3 }
 0x197   : > { %659 = shalt.err (!%p656_p9)
}
 0x198   : > { %s660_s23 = scalar_lea.hbm %s840_s10, 16  ;;  %s664_s8 = scalar_lea.hbm %s912_s4, 32 }
 0x199   : > { %p661_p10 = scmp.ne.s32.totalorder %s840_s10, %s660_s23  ;;  %p665_p13 = scmp.lt.u32.totalorder %s840_s10, %s912_s4 }
 0x19a   : > { %p666_p0 = scmp.lt.u32.totalorder %s664_s8, %s660_s23  ;;  %p668_p2 = scmp.lt.u32.totalorder %s660_s23, %s840_s10 }
 0x19b   : > { %p662_p11 = pnand %p661_p10, %p781_p5 }
 0x19c   : > { %p667_p1 = por %p666_p0, %p665_p13 }
 0x19d   : > { %p663_p12 = pneg %p662_p11 }
 0x19e   : > { %p669_p3 = por %p668_p2, %p667_p1 }
 0x1a0   : > { %p670_p4 = pnand %p669_p3, %p663_p12 }
 0x1a2   : > { %673 = shalt.err (!%p670_p4)
}
 0x1a3   : > { %563 = dma.vmem_to_hbm [thread:$0]  (%p781_p5), %s842_s5, 16, %s840_s10, %s384_s9  }
 0x1a4 PF: > { %p573_p7 = scmp.ge.s32.totalorder %s712_s18, 2  ;;  %s432_s27 = sand.u32 1, %s700_s15  }
 0x1a5   : > { %s433_s28 = scalar_lea.sflag [#allocation3], %s432_s27 }
 0x1a6   : > { %p567_p8 = pnand %p573_p7, %p785_p6 }
 0x1a8   : > { %691 = dma.done.wait (!%p567_p8), %s433_s28, 16  }
 0x1a9   : > { %693 = vsyncadd (!%p567_p8), %s433_s28, 4294967280  ;;  %s441_s6 = scalar_lea.sflag [#allocation5], %s432_s27 }
 0x1aa   : > { %695 = dma.done.wait (!%p567_p8), %s441_s6, 16  }
 0x1ab   : > { %697 = vsyncadd (!%p567_p8), %s441_s6, 4294967280  ;;  %p18_p5 = scmp.ge.s32.totalorder %s768_s21, 4   ;;  %s915_s15 = smov %s704_s16 }
 0x1ac   : > { %s916_s16 = smov %s708_s17  ;;  %s917_s17 = smov %s779_s24 }
 0x1ad   : > { %s918_s18 = smov %s768_s21  ;;  %20 = sbr.rel (!%p18_p5) target bundleno = 5 (0x5), region = 92 }
 0x1b4   :  { %445 = vsyncpa [#allocation3], 1 }
 0x1b5   :  { %447 = vsyncpa [#allocation3 + $0x1], 1 }
 0x1b6   :  { %448 = vsyncpa [#allocation5], 1 }
 0x1b7   :  { %450 = vsyncpa [#allocation5 + $0x1], 1 }

</bundles_post_ra>
